<compile_context>
chip_gen: v7x
topology: tpu7x:2x2x1
jax: 0.10.0
libtpu: 0.0.40
codegen_flags: <defaults>
</compile_context>

<pallas_src>
import jax
import jax.numpy as jnp
from jax.experimental import pallas as pl
from jax.experimental.pallas import tpu as pltpu


def _round_up(a, m):
    return ((a + m - 1) // m) * m


def _cdiv(a, b):
    return (a + b - 1) // b


# ---------------------------------------------------------------------------
# Kernels
# ---------------------------------------------------------------------------
def _ff_kernel_fused(x_ref, w_ref, b_ref, o_ref):
    """Whole-K resident: ReLU (VPU) -> MXU matmul (f32 acc) -> +bias -> store."""
    h = jnp.maximum(x_ref[...], 0).astype(w_ref.dtype)
    acc = jnp.dot(h, w_ref[...], preferred_element_type=jnp.float32)
    o_ref[...] = (acc + b_ref[...]).astype(o_ref.dtype)


def _ff_kernel_ktiled(x_ref, w_ref, b_ref, o_ref, acc_ref):
    """K tiled on the innermost ("arbitrary") grid axis with an f32 accumulator."""
    k = pl.program_id(2)

    @pl.when(k == 0)
    def _():
        acc_ref[...] = jnp.zeros_like(acc_ref)

    h = jnp.maximum(x_ref[...], 0).astype(w_ref.dtype)
    acc_ref[...] += jnp.dot(h, w_ref[...], preferred_element_type=jnp.float32)

    @pl.when(k == pl.num_programs(2) - 1)
    def _():
        o_ref[...] = (acc_ref[...] + b_ref[...]).astype(o_ref.dtype)


# ---------------------------------------------------------------------------
# Wrapper
# ---------------------------------------------------------------------------
def feed_forward(x, w, b, *, tile_m=1024, matmul_dtype="auto", out_dtype=None):
    """x: (..., 4*d), w: (4*d, d) pre-transposed Linear weight, b: (d,).

    Pass x in bf16 (and leave out_dtype=None) to move 2-byte activations /
    outputs over HBM; accumulation and bias add remain f32 inside the kernel.
    """
    orig_shape = x.shape
    K = orig_shape[-1]
    N = w.shape[1]
    assert w.shape[0] == K and b.shape == (N,)

    if out_dtype is None:
        out_dtype = x.dtype
    if matmul_dtype == "auto":
        matmul_dtype = jnp.bfloat16 if x.dtype == jnp.bfloat16 else None

    x2d = x.reshape(-1, K)
    M = x2d.shape[0]

    # ---- lane packing for narrow outputs (d < 128) -------------------------
    pack = 128 // N if (N < 128 and 128 % N == 0) else 1
    K_eff, N_eff = pack * K, pack * N
    if pack > 1:
        w_eff = jnp.kron(jnp.eye(pack, dtype=w.dtype), w)   # block-diagonal, exact
        b_eff = jnp.tile(b, pack)
        row_pad = (-M) % pack                                # at most pack-1 rows
        if row_pad:
            x2d = jnp.pad(x2d, ((0, row_pad), (0, 0)))
        Mp = x2d.shape[0] // pack
        x2d = x2d.reshape(Mp, K_eff)                         # free row-major reshape
    else:
        w_eff, b_eff = w, b
        Mp = M
    if matmul_dtype is not None:
        w_eff = w_eff.astype(matmul_dtype)
    b_eff = b_eff.reshape(1, N_eff).astype(jnp.float32)

    x_bytes = jnp.dtype(x2d.dtype).itemsize
    w_bytes = jnp.dtype(w_eff.dtype).itemsize
    o_bytes = jnp.dtype(out_dtype).itemsize

    # ---- generation-aware VMEM budget ---------------------------------------
    try:
        vmem_cap = int(pltpu.get_tpu_info().vmem_capacity_bytes)
    except Exception:
        vmem_cap = 64 * 1024 * 1024                  # conservative (v7x per-TC)
    budget = (vmem_cap * 3) // 4                     # 48 MiB on v7x, 96 MiB on v5e/v6e

    def vmem_need(tm, tn, tk, w_bufs=None):
        full_w = (tn == N_eff and tk == K_eff)
        if w_bufs is None:
            w_bufs = 1 if full_w else 2              # Buffered(1) when grid-invariant
        b_bufs = 1 if tn == N_eff else 2
        need = (2 * tm * tk * x_bytes                # double-buffered x tile
                + w_bufs * tk * tn * w_bytes         # weight tile(s)
                + b_bufs * 8 * max(tn, 128) * 4      # bias row (layout-padded)
                + 2 * tm * tn * o_bytes)             # double-buffered out tile
        if tk != K_eff:
            need += tm * tn * 4                      # f32 accumulator scratch
        return need

    # ---- tile selection ------------------------------------------------------
    if Mp < 8:
        tm = Mp                                      # block == full dim is legal
    else:
        tm = min(_round_up(tile_m, 8), (Mp // 8) * 8)
    tn = N_eff
    tk = K_eff

    def _next_tk(cur):
        # Largest multiple of 128 that divides K_eff exactly and is < cur.
        # (K must be tiled exactly; a ragged K block would accumulate garbage.)
        best = None
        cand = 128
        while cand < cur:
            if K_eff % cand == 0:
                best = cand
            cand += 128
        return best

    while vmem_need(tm, tn, tk) > budget:
        if tm >= 512:
            tm = _round_up(tm // 2, 8)               # shrink rows first (keep >=256)
        elif tn > 128:
            tn = max(128, _round_up(tn // 2, 128))   # then tile N (ragged N is safe)
        else:
            nxt = _next_tk(tk)
            if nxt is not None:
                tk = nxt                             # then tile K (exact divisor)
            elif tm >= 16:
                tm = _round_up(tm // 2, 8)
            else:
                # TODO(synk): for extreme d where even an (8,128)-row weight slab
                # cannot fit, fall back to an emit_pipeline inner K loop.
                break

    # ---- v7x megacore: ensure >= 2 grid steps on the parallel axes ----------
    while _cdiv(Mp, tm) * _cdiv(N_eff, tn) < 2 and tm >= 16:
        tm = _round_up(tm // 2, 8)

    grid_m = _cdiv(Mp, tm)
    grid_n = _cdiv(N_eff, tn)
    grid_k = K_eff // tk                             # tk always divides K_eff

    vmem_limit = int(min(max(vmem_need(tm, tn, tk, w_bufs=2) * 5 // 4,
                             32 * 1024 * 1024),
                         vmem_cap - 8 * 1024 * 1024))

    cost = pl.CostEstimate(
        flops=2 * Mp * K_eff * N_eff,
        transcendentals=0,
        bytes_accessed=(Mp * K_eff * x_bytes + K_eff * N_eff * w_bytes
                        + N_eff * 4 + Mp * N_eff * o_bytes),
    )

    out_shape = jax.ShapeDtypeStruct((Mp, N_eff), out_dtype)

    def _run(single_buffer):
        def maybe_resident(shape, imap, resident):
            if resident and single_buffer:
                return pl.BlockSpec(shape, imap, pipeline_mode=pl.Buffered(1))
            return pl.BlockSpec(shape, imap)

        if grid_k == 1:
            kernel = _ff_kernel_fused
            grid = (grid_m, grid_n)
            in_specs = [
                pl.BlockSpec((tm, K_eff), lambda i, j: (i, 0)),          # x tile
                maybe_resident((K_eff, tn), lambda i, j: (0, j),
                               resident=(grid_n == 1)),                  # weight
                maybe_resident((1, tn), lambda i, j: (0, j),
                               resident=(grid_n == 1)),                  # bias
            ]
            out_specs = pl.BlockSpec((tm, tn), lambda i, j: (i, j))
            scratch = []
            dims = ("parallel", "parallel")
        else:
            kernel = _ff_kernel_ktiled
            grid = (grid_m, grid_n, grid_k)
            in_specs = [
                pl.BlockSpec((tm, tk), lambda i, j, k: (i, k)),          # x tile
                pl.BlockSpec((tk, tn), lambda i, j, k: (k, j)),          # weight tile
                maybe_resident((1, tn), lambda i, j, k: (0, j),
                               resident=(grid_n == 1)),                  # bias
            ]
            out_specs = pl.BlockSpec((tm, tn), lambda i, j, k: (i, j))
            scratch = [pltpu.VMEM((tm, tn), jnp.float32)]
            dims = ("parallel", "parallel", "arbitrary")

        return pl.pallas_call(
            kernel,
            out_shape=out_shape,
            grid_spec=pltpu.PrefetchScalarGridSpec(
                num_scalar_prefetch=0,
                grid=grid,
                in_specs=in_specs,
                out_specs=out_specs,
                scratch_shapes=scratch,
            ),
            compiler_params=pltpu.CompilerParams(
                dimension_semantics=dims,
                vmem_limit_bytes=vmem_limit,
            ),
            cost_estimate=cost,
        )(x2d, w_eff, b_eff)

    try:
        out = _run(single_buffer=True)
    except Exception:
        # pipeline_mode=pl.Buffered(1) unsupported on this jax build — fall back
        # to default double buffering (only costs VMEM headroom).
        out = _run(single_buffer=False)

    # Unpack lane-dense rows back to (M, N) (free reshapes), drop row padding.
    y = out.reshape(Mp * pack, N)[:M]
    return y.reshape(orig_shape[:-1] + (N,))


def feed_forward_ref(x, w, b):
    return jnp.maximum(x, 0.0) @ w + b


if __name__ == "__main__":
    # intermediate_dim d = 32  ->  input feature dim = 4*d = 128
    d = 32
    batch, seq = 2, 8

    key = jax.random.PRNGKey(0)
    kx, kw, kb = jax.random.split(key, 3)

    x = jax.random.normal(kx, (batch, seq, 4 * d), dtype=jnp.float32)
    # nn.Linear(4*d, d): weight (d, 4*d), bias (d,).  Stored transposed (4*d, d).
    bound = 1.0 / jnp.sqrt(4.0 * d)
    w = jax.random.uniform(kw, (4 * d, d), minval=-bound, maxval=bound,
                           dtype=jnp.float32)
    b = jax.random.uniform(kb, (d,), minval=-bound, maxval=bound,
                           dtype=jnp.float32)

    y_ref = feed_forward_ref(x, w, b)

    # Exact (f32 everywhere) path.
    y = jax.block_until_ready(feed_forward(x, w, b))
    assert y.shape == (batch, seq, d)
    assert jnp.allclose(y, y_ref, atol=1e-5, rtol=1e-5)

    # Bandwidth-optimized path: bf16 activations in / bf16 out, f32 accumulation.
    y_bf16 = jax.block_until_ready(feed_forward(x.astype(jnp.bfloat16), w, b))
    assert y_bf16.shape == (batch, seq, d)
    assert y_bf16.dtype == jnp.bfloat16
    assert jnp.allclose(y_bf16.astype(jnp.float32), y_ref, atol=5e-2, rtol=5e-2)

    print("KERNEL_OK")
</pallas_src>

<mosaic_0001>
module attributes {stable_mosaic.version = 11 : i64} {
  func.func @_ff_kernel_fused(%arg0: i32, %arg1: i32, %arg2: memref<4x512xf32, #tpu.memory_space<vmem>>, %arg3: memref<512x128xf32, #tpu.memory_space<vmem>>, %arg4: memref<1x128xf32, #tpu.memory_space<vmem>>, %arg5: memref<4x128xf32, #tpu.memory_space<vmem>>) attributes {dimension_semantics = [#tpu.dimension_semantics<parallel>, #tpu.dimension_semantics<parallel>], iteration_bounds = array<i64: 1, 1>, scalar_prefetch = 0 : i64, scratch_operands = 0 : i64, tpu.core_type = #tpu.core_type<tc>, window_params = [{transform_indices = @transform_0, window_bounds = array<i64: 4, 512>}, {pipeline_mode = #tpu.pipeline_mode<synchronous>, transform_indices = @transform_1, window_bounds = array<i64: 512, 128>}, {pipeline_mode = #tpu.pipeline_mode<synchronous>, transform_indices = @transform_2, window_bounds = array<i64: 1, 128>}, {transform_indices = @transform_3, window_bounds = array<i64: 4, 128>}]} {
    %c0 = arith.constant 0 : index
    %c0_0 = arith.constant 0 : index
    %0 = vector.load %arg2[%c0, %c0_0] : memref<4x512xf32, #tpu.memory_space<vmem>>, vector<4x512xf32>
    %cst = arith.constant 0.000000e+00 : f32
    %1 = vector.broadcast %cst : f32 to vector<4x512xf32>
    %2 = arith.maximumf %0, %1 : vector<4x512xf32>
    %c0_1 = arith.constant 0 : index
    %c0_2 = arith.constant 0 : index
    %3 = vector.load %arg3[%c0_1, %c0_2] : memref<512x128xf32, #tpu.memory_space<vmem>>, vector<512x128xf32>
    %cst_3 = arith.constant dense<0.000000e+00> : vector<4x128xf32>
    %4 = tpu.matmul %2, %3, %cst_3 {dimension_numbers = #tpu.dot_dimension_numbers<[1], [0], [0], [1], [0, 0, 1, 1], [], []>} : vector<4x512xf32>, vector<512x128xf32>, vector<4x128xf32> -> vector<4x128xf32>
    %c0_4 = arith.constant 0 : index
    %c0_5 = arith.constant 0 : index
    %5 = vector.load %arg4[%c0_4, %c0_5] : memref<1x128xf32, #tpu.memory_space<vmem>>, vector<1x128xf32>
    %6 = vector.broadcast %5 : vector<1x128xf32> to vector<4x128xf32>
    %7 = arith.addf %4, %6 : vector<4x128xf32>
    %c0_6 = arith.constant 0 : index
    %c0_7 = arith.constant 0 : index
    %8 = vector.load %arg5[%c0_6, %c0_7] : memref<4x128xf32, #tpu.memory_space<vmem>>, vector<4x128xf32>
    tpu.vector_store %arg5[%c0_6, %c0_7], %7 {strides = array<i32>} : memref<4x128xf32, #tpu.memory_space<vmem>>, vector<4x128xf32>,
    return
  }
  func.func @transform_0(%arg0: i32, %arg1: i32) -> (i32, i32) {
    %c0_i32 = arith.constant 0 : i32
    %c0_i32_0 = arith.constant 0 : i32
    return %arg0, %c0_i32 : i32, i32
  }
  func.func @transform_1(%arg0: i32, %arg1: i32) -> (i32, i32) {
    %c0_i32 = arith.constant 0 : i32
    %c0_i32_0 = arith.constant 0 : i32
    return %c0_i32, %arg1 : i32, i32
  }
  func.func @transform_2(%arg0: i32, %arg1: i32) -> (i32, i32) {
    %c0_i32 = arith.constant 0 : i32
    %c0_i32_0 = arith.constant 0 : i32
    return %c0_i32, %arg1 : i32, i32
  }
  func.func @transform_3(%arg0: i32, %arg1: i32) -> (i32, i32) {
    %c0_i32 = arith.constant 0 : i32
    return %arg0, %arg1 : i32, i32
  }
}

module attributes {stable_mosaic.version = 11 : i64} {
  func.func @_ff_kernel_fused(%arg0: i32, %arg1: i32, %arg2: memref<4x512xf32, #tpu.memory_space<vmem>>, %arg3: memref<512x128xf32, #tpu.memory_space<vmem>>, %arg4: memref<1x128xf32, #tpu.memory_space<vmem>>, %arg5: memref<4x128xf32, #tpu.memory_space<vmem>>) attributes {dimension_semantics = [#tpu.dimension_semantics<parallel>, #tpu.dimension_semantics<parallel>], iteration_bounds = array<i64: 1, 1>, scalar_prefetch = 0 : i64, scratch_operands = 0 : i64, tpu.core_type = #tpu.core_type<tc>, window_params = [{transform_indices = @transform_0, window_bounds = array<i64: 4, 512>}, {transform_indices = @transform_1, window_bounds = array<i64: 512, 128>}, {transform_indices = @transform_2, window_bounds = array<i64: 1, 128>}, {transform_indices = @transform_3, window_bounds = array<i64: 4, 128>}]} {
    %c0 = arith.constant 0 : index
    %c0_0 = arith.constant 0 : index
    %0 = vector.load %arg2[%c0, %c0_0] : memref<4x512xf32, #tpu.memory_space<vmem>>, vector<4x512xf32>
    %cst = arith.constant 0.000000e+00 : f32
    %1 = vector.broadcast %cst : f32 to vector<4x512xf32>
    %2 = arith.maximumf %0, %1 : vector<4x512xf32>
    %c0_1 = arith.constant 0 : index
    %c0_2 = arith.constant 0 : index
    %3 = vector.load %arg3[%c0_1, %c0_2] : memref<512x128xf32, #tpu.memory_space<vmem>>, vector<512x128xf32>
    %cst_3 = arith.constant dense<0.000000e+00> : vector<4x128xf32>
    %4 = tpu.matmul %2, %3, %cst_3 {dimension_numbers = #tpu.dot_dimension_numbers<[1], [0], [0], [1], [0, 0, 1, 1], [], []>} : vector<4x512xf32>, vector<512x128xf32>, vector<4x128xf32> -> vector<4x128xf32>
    %c0_4 = arith.constant 0 : index
    %c0_5 = arith.constant 0 : index
    %5 = vector.load %arg4[%c0_4, %c0_5] : memref<1x128xf32, #tpu.memory_space<vmem>>, vector<1x128xf32>
    %6 = vector.broadcast %5 : vector<1x128xf32> to vector<4x128xf32>
    %7 = arith.addf %4, %6 : vector<4x128xf32>
    %c0_6 = arith.constant 0 : index
    %c0_7 = arith.constant 0 : index
    %8 = vector.load %arg5[%c0_6, %c0_7] : memref<4x128xf32, #tpu.memory_space<vmem>>, vector<4x128xf32>
    tpu.vector_store %arg5[%c0_6, %c0_7], %7 {strides = array<i32>} : memref<4x128xf32, #tpu.memory_space<vmem>>, vector<4x128xf32>,
    return
  }
  func.func @transform_0(%arg0: i32, %arg1: i32) -> (i32, i32) {
    %c0_i32 = arith.constant 0 : i32
    %c0_i32_0 = arith.constant 0 : i32
    return %arg0, %c0_i32 : i32, i32
  }
  func.func @transform_1(%arg0: i32, %arg1: i32) -> (i32, i32) {
    %c0_i32 = arith.constant 0 : i32
    %c0_i32_0 = arith.constant 0 : i32
    return %c0_i32, %arg1 : i32, i32
  }
  func.func @transform_2(%arg0: i32, %arg1: i32) -> (i32, i32) {
    %c0_i32 = arith.constant 0 : i32
    %c0_i32_0 = arith.constant 0 : i32
    return %c0_i32, %arg1 : i32, i32
  }
  func.func @transform_3(%arg0: i32, %arg1: i32) -> (i32, i32) {
    %c0_i32 = arith.constant 0 : i32
    return %arg0, %arg1 : i32, i32
  }
}

</mosaic_0001>

<bundles_post_ra>
// kernel: tpu_custom_call.1
= control target key start
LH: loop header
LB: loop body
LE: loop exit
PB: predicated region body
PF: predicated region fallthrough
CT: control target
= control target key end

     0   :  { %8 = vsyncpa [#allocation3], 0  ;;  %s562_s0 = inlined_call_operand.hbm [shape: f32[4,512], index: 0, kind: input, shape index: {}]   ;;  %s563_s1 = inlined_call_operand.hbm [shape: f32[512,128], index: 1, kind: input, shape index: {}]   ;;  %s564_s2 = inlined_call_operand.vmem [shape: f32[1,128], index: 2, kind: input, shape index: {}]   ;;  %s565_s3 = inlined_call_operand.hbm [shape: f32[4,128], index: 3, kind: output, shape index: {}]  }
   0x1   :  { %9 = vsyncpa [#allocation6], 0 }
   0x2   :  { %10 = vsyncpa [#allocation4], 0  ;;  %s491_s12 = smov [#allocation2]   ;;  %s492_s14 = smov [#allocation5]  }
   0x3   :  { %s17_s13 = sshll.u32 %s491_s12, 4  ;;  %s26_s15 = sshll.u32 %s492_s14, 4  ;;  %s18_s13 = int_to_ptr.vmem [resolvable:$true] %s17_s13  ;;  %s516_s15 = int_to_ptr.vmem [resolvable:$true] %s26_s15 }
   0x4   :  { %s419_s18 = scalar_lea.hbm %s562_s0, 256 }
   0x5   :  { %p420_p0 = scmp.ne.s32.totalorder %s562_s0, %s419_s18  ;;  %p423_p1 = scmp.lt.u32.totalorder %s419_s18, %s562_s0 }
   0x7   :  { %p425_p2 = pnand %p423_p1, %p420_p0 }
   0x9   :  { %428 = shalt.err (!%p425_p2)
}
   0xa   :  { %s429_s23 = scalar_lea.vmem %s18_s13, 256  ;;  %p434_p4 = scmp.lt.s32.totalorder %s18_s13, %s18_s13 }
   0xb   :  { %p430_p3 = scmp.ne.s32.totalorder %s18_s13, %s429_s23  ;;  %p435_p5 = scmp.lt.s32.totalorder %s429_s23, %s429_s23 }
   0xd   :  { %p436_p6 = por %p435_p5, %p434_p4 }
   0xf   :  { %p437_p7 = pnand %p436_p6, %p430_p3 }
  0x11   :  { %440 = shalt.err (!%p437_p7)
}
  0x12   :  { %20 = dma.hbm_to_vmem [thread:$0]  %s562_s0, 256, %s18_s13, [#allocation3]  }
  0x13   :  { %s441_s28 = scalar_lea.hbm %s563_s1, 8192 }
  0x14   :  { %p442_p8 = scmp.ne.s32.totalorder %s563_s1, %s441_s28  ;;  %p445_p9 = scmp.lt.u32.totalorder %s441_s28, %s563_s1 }
  0x16   :  { %p447_p10 = pnand %p445_p9, %p442_p8 }
  0x18   :  { %450 = shalt.err (!%p447_p10)
}
  0x19   :  { %s451_s6 = scalar_lea.vmem %s516_s15, 8192  ;;  %p456_p12 = scmp.lt.s32.totalorder %s516_s15, %s516_s15 }
  0x1a   :  { %p452_p11 = scmp.ne.s32.totalorder %s516_s15, %s451_s6  ;;  %p457_p13 = scmp.lt.s32.totalorder %s451_s6, %s451_s6 }
  0x1c   :  { %p458_p0 = por %p457_p13, %p456_p12 }
  0x1e   :  { %p459_p1 = pnand %p458_p0, %p452_p11 }
  0x20   :  { %462 = shalt.err (!%p459_p1)
}
  0x21   :  { %s493_s0 = smov 128   ;;  %s494_s7 = smov 8  }
  0x22   :  { %32 = dma.hbm_to_vmem [thread:$0]  %s563_s1, 8192, %s516_s15, [#allocation6], %s493_s0, %s493_s0, %s494_s7  }
  0x23   :  { %485 = dma.done.wait [#allocation3], 256  }
  0x24   :  { %486 = vsyncadd [#allocation3], 4294967040 }
  0x25   :  { %487 = dma.done.wait [#allocation6], 8192  }
  0x26   :  { %488 = vsyncadd [#allocation6], 4294959104  ;;  %v61_v0 = vld [vmem:[#allocation5 + $0x80] sm:$0xff]  ;;  %v62_v1 = vld [vmem:[#allocation5 + $0x88] sm:$0xff]  ;;  %s495_s11 = smov [#allocation7]  }
  0x27   :  { %v45_v2 = vld [vmem:[#allocation5] sm:$0xff]  ;;  %v350_v3 = vpack.c.bf16 %v62_v1, %v61_v0  ;;  %v46_v4 = vld [vmem:[#allocation5 + $0x8] sm:$0xff]  ;;  %v63_v11 = vld [vmem:[#allocation5 + $0x90] sm:$0xff]  ;;  %s269_s12 = sshll.u32 %s495_s11, 4  ;;  %s270_s12 = int_to_ptr.vmem [resolvable:$true] %s269_s12 }
  0x28   :  { %v93_v5 = vld [vmem:[#allocation5 + $0x180] sm:$0xff]  ;;  %v94_v6 = vld [vmem:[#allocation5 + $0x188] sm:$0xff]  ;;  %v352_v7 = vpack.c.bf16 %v46_v4, %v45_v2  ;;  %v64_v13 = vld [vmem:[#allocation5 + $0x98] sm:$0xff]  ;;  %s463_s13 = scalar_lea.vmem %s270_s12, 64  ;;  %p468_p3 = scmp.lt.s32.totalorder %s270_s12, %s270_s12 }
  0x29   :  { %v382_v8 = vpack.c.bf16 %v94_v6, %v93_v5  ;;  %v77_v9 = vld [vmem:[#allocation5 + $0x100] sm:$0xff]  ;;  %v78_v10 = vld [vmem:[#allocation5 + $0x108] sm:$0xff]  ;;  %351 = vmatprep.subr.bf16.mxu0 %v350_v3  ;;  %v47_v14 = vld [vmem:[#allocation5 + $0x10] sm:$0xff]  ;;  %v354_v16 = vpack.c.bf16 %v64_v13, %v63_v11  ;;  %p464_p2 = scmp.ne.s32.totalorder %s270_s12, %s463_s13  ;;  %p469_p4 = scmp.lt.s32.totalorder %s463_s13, %s463_s13 }
  0x2a   :  { %v384_v12 = vpack.c.bf16 %v78_v10, %v77_v9  ;;  %v48_v15 = vld [vmem:[#allocation5 + $0x18] sm:$0xff]  ;;  %353 = vmatpush3.bf16.msra.mxu0 %v352_v7  ;;  %v95_v18 = vld [vmem:[#allocation5 + $0x190] sm:$0xff]  ;;  %v65_v23 = vld [vmem:[#allocation5 + $0xa0] sm:$0xff] }
  0x2b   :  { %383 = vmatprep.subr.bf16.mxu1 %v382_v8  ;;  %v356_v17 = vpack.c.bf16 %v48_v15, %v47_v14  ;;  %v96_v19 = vld [vmem:[#allocation5 + $0x198] sm:$0xff]  ;;  %v79_v20 = vld [vmem:[#allocation5 + $0x110] sm:$0xff]  ;;  %v66_v24 = vld [vmem:[#allocation5 + $0xa8] sm:$0xff]  ;;  %355 = vmatprep.subr.bf16.mxu0 %v354_v16  ;;  %p470_p5 = por %p469_p4, %p468_p3 }
  0x2c   :  { %385 = vmatpush3.bf16.msra.mxu1 %v384_v12  ;;  %v386_v21 = vpack.c.bf16 %v96_v19, %v95_v18  ;;  %v80_v22 = vld [vmem:[#allocation5 + $0x118] sm:$0xff]  ;;  %v358_v26 = vpack.c.bf16 %v66_v24, %v65_v23  ;;  %v49_v27 = vld [vmem:[#allocation5 + $0x20] sm:$0xff]  ;;  %v50_v28 = vld [vmem:[#allocation5 + $0x28] sm:$0xff] }
  0x2d   :  { %v388_v25 = vpack.c.bf16 %v80_v22, %v79_v20  ;;  %v97_v29 = vld [vmem:[#allocation5 + $0x1a0] sm:$0xff]  ;;  %v98_v30 = vld [vmem:[#allocation5 + $0x1a8] sm:$0xff]  ;;  %v360_v33 = vpack.c.bf16 %v50_v28, %v49_v27  ;;  %v67_v35 = vld [vmem:[#allocation5 + $0xb0] sm:$0xff]  ;;  %p471_p6 = pnand %p470_p5, %p464_p2 }
  0x2e   :  { %387 = vmatprep.subr.bf16.mxu1 %v386_v21  ;;  %v81_v31 = vld [vmem:[#allocation5 + $0x120] sm:$0xff]  ;;  %v82_v32 = vld [vmem:[#allocation5 + $0x128] sm:$0xff]  ;;  %357 = vmatpush3.bf16.msra.mxu0 %v356_v17  ;;  %v390_v34 = vpack.c.bf16 %v98_v30, %v97_v29  ;;  %v68_v36 = vld [vmem:[#allocation5 + $0xb8] sm:$0xff] }
  0x2f   :  { %v51_v37 = vld [vmem:[#allocation5 + $0x30] sm:$0xff]  ;;  %359 = vmatprep.subr.bf16.mxu0 %v358_v26  ;;  %v392_v38 = vpack.c.bf16 %v82_v32, %v81_v31  ;;  %v362_v39 = vpack.c.bf16 %v68_v36, %v67_v35  ;;  %v52_v40 = vld [vmem:[#allocation5 + $0x38] sm:$0xff]  ;;  %v69_v46 = vld [vmem:[#allocation5 + $0xc0] sm:$0xff] }
  0x30   :  { %389 = vmatpush3.bf16.msra.mxu1 %v388_v25  ;;  %v99_v41 = vld [vmem:[#allocation5 + $0x1b0] sm:$0xff]  ;;  %v100_v42 = vld [vmem:[#allocation5 + $0x1b8] sm:$0xff]  ;;  %v70_v47 = vld [vmem:[#allocation5 + $0xc8] sm:$0xff]  ;;  %v364_v48 = vpack.c.bf16 %v52_v40, %v51_v37 }
  0x31   :  { %391 = vmatprep.subr.bf16.mxu1 %v390_v34  ;;  %v394_v43 = vpack.c.bf16 %v100_v42, %v99_v41  ;;  %v83_v44 = vld [vmem:[#allocation5 + $0x130] sm:$0xff]  ;;  %v84_v45 = vld [vmem:[#allocation5 + $0x138] sm:$0xff]  ;;  %v101_v49 = vld [vmem:[#allocation5 + $0x1c0] sm:$0xff]  ;;  %v366_v52 = vpack.c.bf16 %v70_v47, %v69_v46 }
  0x32   :  { %361 = vmatpush3.bf16.msra.mxu0 %v360_v33  ;;  %v102_v50 = vld [vmem:[#allocation5 + $0x1c8] sm:$0xff]  ;;  %v396_v51 = vpack.c.bf16 %v84_v45, %v83_v44  ;;  %v53_v53 = vld [vmem:[#allocation5 + $0x40] sm:$0xff]  ;;  %v71_v58 = vld [vmem:[#allocation5 + $0xd0] sm:$0xff] }
  0x33   :  { %363 = vmatprep.subr.bf16.mxu0 %v362_v39  ;;  %v54_v54 = vld [vmem:[#allocation5 + $0x48] sm:$0xff]  ;;  %v85_v55 = vld [vmem:[#allocation5 + $0x140] sm:$0xff]  ;;  %v398_v56 = vpack.c.bf16 %v102_v50, %v101_v49  ;;  %v72_v59 = vld [vmem:[#allocation5 + $0xd8] sm:$0xff] }
  0x34   :  { %393 = vmatpush3.bf16.msra.mxu1 %v392_v38  ;;  %v86_v57 = vld [vmem:[#allocation5 + $0x148] sm:$0xff]  ;;  %v103_v60 = vld [vmem:[#allocation5 + $0x1d0] sm:$0xff]  ;;  %v104_v61 = vld [vmem:[#allocation5 + $0x1d8] sm:$0xff]  ;;  %v368_v62 = vpack.c.bf16 %v54_v54, %v53_v53  ;;  %v370_v0 = vpack.c.bf16 %v72_v59, %v71_v58 }
  0x35   :  { %395 = vmatprep.subr.bf16.mxu1 %v394_v43  ;;  %v400_v63 = vpack.c.bf16 %v86_v57, %v85_v55  ;;  %v55_v1 = vld [vmem:[#allocation5 + $0x50] sm:$0xff]  ;;  %v56_v2 = vld [vmem:[#allocation5 + $0x58] sm:$0xff]  ;;  %v402_v4 = vpack.c.bf16 %v104_v61, %v103_v60  ;;  %v73_v6 = vld [vmem:[#allocation5 + $0xe0] sm:$0xff] }
  0x36   :  { %365 = vmatpush3.bf16.msra.mxu0 %v364_v48  ;;  %v87_v3 = vld [vmem:[#allocation5 + $0x150] sm:$0xff]  ;;  %v88_v5 = vld [vmem:[#allocation5 + $0x158] sm:$0xff]  ;;  %v74_v7 = vld [vmem:[#allocation5 + $0xe8] sm:$0xff]  ;;  %v372_v10 = vpack.c.bf16 %v56_v2, %v55_v1 }
  0x37   :  { %367 = vmatprep.subr.bf16.mxu0 %v366_v52  ;;  %v105_v8 = vld [vmem:[#allocation5 + $0x1e0] sm:$0xff]  ;;  %v106_v9 = vld [vmem:[#allocation5 + $0x1e8] sm:$0xff]  ;;  %v404_v13 = vpack.c.bf16 %v88_v5, %v87_v3  ;;  %v374_v14 = vpack.c.bf16 %v74_v7, %v73_v6  ;;  %v41_v16 = vld [vmem:[#allocation2] sm:$0xff] }
  0x38   :  { %397 = vmatpush3.bf16.msra.mxu1 %v396_v51  ;;  %v57_v11 = vld [vmem:[#allocation5 + $0x60] sm:$0xff]  ;;  %v58_v12 = vld [vmem:[#allocation5 + $0x68] sm:$0xff]  ;;  %v42_v17 = vld [vmem:[#allocation2 + $0x8] sm:$0xff]  ;;  %v406_v18 = vpack.c.bf16 %v106_v9, %v105_v8  ;;  %v43_v22 = vmax.f32 %v41_v16, 0.0 }
  0x39   :  { %399 = vmatprep.subr.bf16.mxu1 %v398_v56  ;;  %v89_v15 = vld [vmem:[#allocation5 + $0x160] sm:$0xff]  ;;  %v90_v19 = vld [vmem:[#allocation5 + $0x168] sm:$0xff]  ;;  %v75_v20 = vld [vmem:[#allocation5 + $0xf0] sm:$0xff]  ;;  %v44_v23 = vmax.f32 %v42_v17, 0.0  ;;  %v376_v26 = vpack.c.bf16 %v58_v12, %v57_v11 }
  0x3a   :  { %369 = vmatpush3.bf16.msra.mxu0 %v368_v62  ;;  %v76_v21 = vld [vmem:[#allocation5 + $0xf8] sm:$0xff]  ;;  %v107_v24 = vld [vmem:[#allocation5 + $0x1f0] sm:$0xff]  ;;  %v118_v27 = vcombine.high %v43_v22, %v43_v22  ;;  %v408_v29 = vpack.c.bf16 %v90_v19, %v89_v15 }
  0x3b   :  { %371 = vmatprep.subr.bf16.mxu0 %v370_v0  ;;  %v108_v25 = vld [vmem:[#allocation5 + $0x1f8] sm:$0xff]  ;;  %v119_v28 = vcombine.high %v44_v23, %v44_v23  ;;  %v378_v30 = vpack.c.bf16 %v76_v21, %v75_v20  ;;  %v59_v31 = vld [vmem:[#allocation5 + $0x70] sm:$0xff] }
  0x3c   :  { %401 = vmatpush3.bf16.msra.mxu1 %v400_v63  ;;  %v60_v32 = vld [vmem:[#allocation5 + $0x78] sm:$0xff]  ;;  %v410_v33 = vpack.c.bf16 %v108_v25, %v107_v24  ;;  %v91_v34 = vld [vmem:[#allocation5 + $0x170] sm:$0xff]  ;;  %186 = vmatprep.mubr.f32.mxu0 %v118_v27 }
  0x3d   :  { %403 = vmatprep.subr.bf16.mxu1 %v402_v4  ;;  %v92_v35 = vld [vmem:[#allocation5 + $0x178] sm:$0xff]  ;;  %256 = vmatprep.mubr.f32.mxu1 %v119_v28  ;;  %v380_v36 = vpack.c.bf16 %v60_v32, %v59_v31  ;;  %v279_v39 = vld [vmem:[%s564_s2] ss:$0 sm:$0xff] }
  0x3e   :  { %373 = vmatpush3.bf16.msra.mxu0 %v372_v10  ;;  %v412_v37 = vpack.c.bf16 %v92_v35, %v91_v34 }
  0x3f   :  { %375 = vmatprep.subr.bf16.mxu0 %v374_v14 }
  0x40   :  { %405 = vmatpush3.bf16.msra.mxu1 %v404_v13 }
  0x41   :  { %407 = vmatprep.subr.bf16.mxu1 %v406_v18 }
  0x42   :  { %377 = vmatpush3.bf16.msra.mxu0 %v376_v26 }
  0x43   :  { %379 = vmatprep.subr.bf16.mxu0 %v378_v30 }
  0x44   :  { %409 = vmatpush3.bf16.msra.mxu1 %v408_v29 }
  0x45   :  { %411 = vmatprep.subr.bf16.mxu1 %v410_v33 }
  0x46   :  { %381 = vmatpush3.bf16.msra.mxu0 %v380_v36 }
  0x48   :  { %413 = vmatpush3.bf16.msra.mxu1 %v412_v37 }
  0x49   :  { %187 = vmatmul.mubr.f32.vlgmr.msra.gmra.mrb[0].mxu0 %v43_v22 }
  0x4b   :  { %257 = vmatmul.mubr.f32.vlgmr.msra.gmra.mrb[0].mxu1 %v44_v23 }
 0x11c   :  { %v312_v38 = vpop.f32.mrb[0].mxu0 }
 0x11d   :  { %v313_v40 = vpop.f32.mrb[1].mxu0 }
 0x11e   :  { %v347_v41 = vpop.f32.mrb[0].mxu1  ;;  %v314_v42 = vadd.f32 %v313_v40, %v312_v38 }
 0x11f   :  { %v348_v43 = vpop.f32.mrb[1].mxu1 }
 0x120   :  { %v349_v44 = vadd.f32 %v348_v43, %v347_v41  ;;  %v189_v45 = vadd.f32 %v314_v42, %v279_v39 }
 0x122   :  { %v259_v46 = vadd.f32 %v349_v44, %v189_v45 }
 0x124   :  { %262 = vst [vmem:[#allocation7] sm:$0xf] %v259_v46 }
 0x125   :  { %474 = shalt.err (!%p471_p6)
}
 0x126   :  { %s475_s15 = scalar_lea.hbm %s565_s3, 64 }
 0x127   :  { %p476_p7 = scmp.ne.s32.totalorder %s565_s3, %s475_s15  ;;  %p479_p8 = scmp.lt.u32.totalorder %s475_s15, %s565_s3 }
 0x129   :  { %p481_p9 = pnand %p479_p8, %p476_p7 }
 0x12b   :  { %484 = shalt.err (!%p481_p9)
}
 0x12c   :  { %272 = dma.vmem_to_hbm [thread:$0]  %s270_s12, 64, %s565_s3, [#allocation4]  }
 0x12d   :  { %489 = dma.done.wait [#allocation4], 64  }
 0x12e   :  { %490 = vsyncadd [#allocation4], 4294967232 }
 0x12f   :  { %276 = vsyncpa [#allocation3], 1 }
 0x130   :  { %277 = vsyncpa [#allocation6], 1 }
 0x131   :  { %278 = vsyncpa [#allocation4], 1 }

// kernel: tpu_custom_call.1
= control target key start
LH: loop header
LB: loop body
LE: loop exit
PB: predicated region body
PF: predicated region fallthrough
CT: control target
= control target key end

     0   :  { %8 = vsyncpa [#allocation3], 0  ;;  %s562_s0 = inlined_call_operand.hbm [shape: f32[4,512], index: 0, kind: input, shape index: {}]   ;;  %s563_s1 = inlined_call_operand.hbm [shape: f32[512,128], index: 1, kind: input, shape index: {}]   ;;  %s564_s2 = inlined_call_operand.vmem [shape: f32[1,128], index: 2, kind: input, shape index: {}]   ;;  %s565_s3 = inlined_call_operand.hbm [shape: f32[4,128], index: 3, kind: output, shape index: {}]  }
   0x1   :  { %9 = vsyncpa [#allocation6], 0 }
   0x2   :  { %10 = vsyncpa [#allocation4], 0  ;;  %s491_s12 = smov [#allocation2]   ;;  %s492_s14 = smov [#allocation5]  }
   0x3   :  { %s17_s13 = sshll.u32 %s491_s12, 4  ;;  %s26_s15 = sshll.u32 %s492_s14, 4  ;;  %s18_s13 = int_to_ptr.vmem [resolvable:$true] %s17_s13  ;;  %s516_s15 = int_to_ptr.vmem [resolvable:$true] %s26_s15 }
   0x4   :  { %s419_s18 = scalar_lea.hbm %s562_s0, 256 }
   0x5   :  { %p420_p0 = scmp.ne.s32.totalorder %s562_s0, %s419_s18  ;;  %p423_p1 = scmp.lt.u32.totalorder %s419_s18, %s562_s0 }
   0x7   :  { %p425_p2 = pnand %p423_p1, %p420_p0 }
   0x9   :  { %428 = shalt.err (!%p425_p2)
}
   0xa   :  { %s429_s23 = scalar_lea.vmem %s18_s13, 256  ;;  %p434_p4 = scmp.lt.s32.totalorder %s18_s13, %s18_s13 }
   0xb   :  { %p430_p3 = scmp.ne.s32.totalorder %s18_s13, %s429_s23  ;;  %p435_p5 = scmp.lt.s32.totalorder %s429_s23, %s429_s23 }
   0xd   :  { %p436_p6 = por %p435_p5, %p434_p4 }
   0xf   :  { %p437_p7 = pnand %p436_p6, %p430_p3 }
  0x11   :  { %440 = shalt.err (!%p437_p7)
}
  0x12   :  { %20 = dma.hbm_to_vmem [thread:$0]  %s562_s0, 256, %s18_s13, [#allocation3]  }
  0x13   :  { %s441_s28 = scalar_lea.hbm %s563_s1, 8192 }
  0x14   :  { %p442_p8 = scmp.ne.s32.totalorder %s563_s1, %s441_s28  ;;  %p445_p9 = scmp.lt.u32.totalorder %s441_s28, %s563_s1 }
  0x16   :  { %p447_p10 = pnand %p445_p9, %p442_p8 }
  0x18   :  { %450 = shalt.err (!%p447_p10)
}
  0x19   :  { %s451_s6 = scalar_lea.vmem %s516_s15, 8192  ;;  %p456_p12 = scmp.lt.s32.totalorder %s516_s15, %s516_s15 }
  0x1a   :  { %p452_p11 = scmp.ne.s32.totalorder %s516_s15, %s451_s6  ;;  %p457_p13 = scmp.lt.s32.totalorder %s451_s6, %s451_s6 }
  0x1c   :  { %p458_p0 = por %p457_p13, %p456_p12 }
  0x1e   :  { %p459_p1 = pnand %p458_p0, %p452_p11 }
  0x20   :  { %462 = shalt.err (!%p459_p1)
}
  0x21   :  { %s493_s0 = smov 128   ;;  %s494_s7 = smov 8  }
  0x22   :  { %32 = dma.hbm_to_vmem [thread:$0]  %s563_s1, 8192, %s516_s15, [#allocation6], %s493_s0, %s493_s0, %s494_s7  }
  0x23   :  { %485 = dma.done.wait [#allocation3], 256  }
  0x24   :  { %486 = vsyncadd [#allocation3], 4294967040 }
  0x25   :  { %487 = dma.done.wait [#allocation6], 8192  }
  0x26   :  { %488 = vsyncadd [#allocation6], 4294959104  ;;  %v61_v0 = vld [vmem:[#allocation5 + $0x80] sm:$0xff]  ;;  %v62_v1 = vld [vmem:[#allocation5 + $0x88] sm:$0xff]  ;;  %s495_s11 = smov [#allocation7]  }
  0x27   :  { %v45_v2 = vld [vmem:[#allocation5] sm:$0xff]  ;;  %v350_v3 = vpack.c.bf16 %v62_v1, %v61_v0  ;;  %v46_v4 = vld [vmem:[#allocation5 + $0x8] sm:$0xff]  ;;  %v63_v11 = vld [vmem:[#allocation5 + $0x90] sm:$0xff]  ;;  %s269_s12 = sshll.u32 %s495_s11, 4  ;;  %s270_s12 = int_to_ptr.vmem [resolvable:$true] %s269_s12 }
  0x28   :  { %v93_v5 = vld [vmem:[#allocation5 + $0x180] sm:$0xff]  ;;  %v94_v6 = vld [vmem:[#allocation5 + $0x188] sm:$0xff]  ;;  %v352_v7 = vpack.c.bf16 %v46_v4, %v45_v2  ;;  %v64_v13 = vld [vmem:[#allocation5 + $0x98] sm:$0xff]  ;;  %s463_s13 = scalar_lea.vmem %s270_s12, 64  ;;  %p468_p3 = scmp.lt.s32.totalorder %s270_s12, %s270_s12 }
  0x29   :  { %v382_v8 = vpack.c.bf16 %v94_v6, %v93_v5  ;;  %v77_v9 = vld [vmem:[#allocation5 + $0x100] sm:$0xff]  ;;  %v78_v10 = vld [vmem:[#allocation5 + $0x108] sm:$0xff]  ;;  %351 = vmatprep.subr.bf16.mxu0 %v350_v3  ;;  %v47_v14 = vld [vmem:[#allocation5 + $0x10] sm:$0xff]  ;;  %v354_v16 = vpack.c.bf16 %v64_v13, %v63_v11  ;;  %p464_p2 = scmp.ne.s32.totalorder %s270_s12, %s463_s13  ;;  %p469_p4 = scmp.lt.s32.totalorder %s463_s13, %s463_s13 }
  0x2a   :  { %v384_v12 = vpack.c.bf16 %v78_v10, %v77_v9  ;;  %v48_v15 = vld [vmem:[#allocation5 + $0x18] sm:$0xff]  ;;  %353 = vmatpush3.bf16.msra.mxu0 %v352_v7  ;;  %v95_v18 = vld [vmem:[#allocation5 + $0x190] sm:$0xff]  ;;  %v65_v23 = vld [vmem:[#allocation5 + $0xa0] sm:$0xff] }
  0x2b   :  { %383 = vmatprep.subr.bf16.mxu1 %v382_v8  ;;  %v356_v17 = vpack.c.bf16 %v48_v15, %v47_v14  ;;  %v96_v19 = vld [vmem:[#allocation5 + $0x198] sm:$0xff]  ;;  %v79_v20 = vld [vmem:[#allocation5 + $0x110] sm:$0xff]  ;;  %v66_v24 = vld [vmem:[#allocation5 + $0xa8] sm:$0xff]  ;;  %355 = vmatprep.subr.bf16.mxu0 %v354_v16  ;;  %p470_p5 = por %p469_p4, %p468_p3 }
  0x2c   :  { %385 = vmatpush3.bf16.msra.mxu1 %v384_v12  ;;  %v386_v21 = vpack.c.bf16 %v96_v19, %v95_v18  ;;  %v80_v22 = vld [vmem:[#allocation5 + $0x118] sm:$0xff]  ;;  %v358_v26 = vpack.c.bf16 %v66_v24, %v65_v23  ;;  %v49_v27 = vld [vmem:[#allocation5 + $0x20] sm:$0xff]  ;;  %v50_v28 = vld [vmem:[#allocation5 + $0x28] sm:$0xff] }
  0x2d   :  { %v388_v25 = vpack.c.bf16 %v80_v22, %v79_v20  ;;  %v97_v29 = vld [vmem:[#allocation5 + $0x1a0] sm:$0xff]  ;;  %v98_v30 = vld [vmem:[#allocation5 + $0x1a8] sm:$0xff]  ;;  %v360_v33 = vpack.c.bf16 %v50_v28, %v49_v27  ;;  %v67_v35 = vld [vmem:[#allocation5 + $0xb0] sm:$0xff]  ;;  %p471_p6 = pnand %p470_p5, %p464_p2 }
  0x2e   :  { %387 = vmatprep.subr.bf16.mxu1 %v386_v21  ;;  %v81_v31 = vld [vmem:[#allocation5 + $0x120] sm:$0xff]  ;;  %v82_v32 = vld [vmem:[#allocation5 + $0x128] sm:$0xff]  ;;  %357 = vmatpush3.bf16.msra.mxu0 %v356_v17  ;;  %v390_v34 = vpack.c.bf16 %v98_v30, %v97_v29  ;;  %v68_v36 = vld [vmem:[#allocation5 + $0xb8] sm:$0xff] }
  0x2f   :  { %v51_v37 = vld [vmem:[#allocation5 + $0x30] sm:$0xff]  ;;  %359 = vmatprep.subr.bf16.mxu0 %v358_v26  ;;  %v392_v38 = vpack.c.bf16 %v82_v32, %v81_v31  ;;  %v362_v39 = vpack.c.bf16 %v68_v36, %v67_v35  ;;  %v52_v40 = vld [vmem:[#allocation5 + $0x38] sm:$0xff]  ;;  %v69_v46 = vld [vmem:[#allocation5 + $0xc0] sm:$0xff] }
  0x30   :  { %389 = vmatpush3.bf16.msra.mxu1 %v388_v25  ;;  %v99_v41 = vld [vmem:[#allocation5 + $0x1b0] sm:$0xff]  ;;  %v100_v42 = vld [vmem:[#allocation5 + $0x1b8] sm:$0xff]  ;;  %v70_v47 = vld [vmem:[#allocation5 + $0xc8] sm:$0xff]  ;;  %v364_v48 = vpack.c.bf16 %v52_v40, %v51_v37 }
  0x31   :  { %391 = vmatprep.subr.bf16.mxu1 %v390_v34  ;;  %v394_v43 = vpack.c.bf16 %v100_v42, %v99_v41  ;;  %v83_v44 = vld [vmem:[#allocation5 + $0x130] sm:$0xff]  ;;  %v84_v45 = vld [vmem:[#allocation5 + $0x138] sm:$0xff]  ;;  %v101_v49 = vld [vmem:[#allocation5 + $0x1c0] sm:$0xff]  ;;  %v366_v52 = vpack.c.bf16 %v70_v47, %v69_v46 }
  0x32   :  { %361 = vmatpush3.bf16.msra.mxu0 %v360_v33  ;;  %v102_v50 = vld [vmem:[#allocation5 + $0x1c8] sm:$0xff]  ;;  %v396_v51 = vpack.c.bf16 %v84_v45, %v83_v44  ;;  %v53_v53 = vld [vmem:[#allocation5 + $0x40] sm:$0xff]  ;;  %v71_v58 = vld [vmem:[#allocation5 + $0xd0] sm:$0xff] }
  0x33   :  { %363 = vmatprep.subr.bf16.mxu0 %v362_v39  ;;  %v54_v54 = vld [vmem:[#allocation5 + $0x48] sm:$0xff]  ;;  %v85_v55 = vld [vmem:[#allocation5 + $0x140] sm:$0xff]  ;;  %v398_v56 = vpack.c.bf16 %v102_v50, %v101_v49  ;;  %v72_v59 = vld [vmem:[#allocation5 + $0xd8] sm:$0xff] }
  0x34   :  { %393 = vmatpush3.bf16.msra.mxu1 %v392_v38  ;;  %v86_v57 = vld [vmem:[#allocation5 + $0x148] sm:$0xff]  ;;  %v103_v60 = vld [vmem:[#allocation5 + $0x1d0] sm:$0xff]  ;;  %v104_v61 = vld [vmem:[#allocation5 + $0x1d8] sm:$0xff]  ;;  %v368_v62 = vpack.c.bf16 %v54_v54, %v53_v53  ;;  %v370_v0 = vpack.c.bf16 %v72_v59, %v71_v58 }
  0x35   :  { %395 = vmatprep.subr.bf16.mxu1 %v394_v43  ;;  %v400_v63 = vpack.c.bf16 %v86_v57, %v85_v55  ;;  %v55_v1 = vld [vmem:[#allocation5 + $0x50] sm:$0xff]  ;;  %v56_v2 = vld [vmem:[#allocation5 + $0x58] sm:$0xff]  ;;  %v402_v4 = vpack.c.bf16 %v104_v61, %v103_v60  ;;  %v73_v6 = vld [vmem:[#allocation5 + $0xe0] sm:$0xff] }
  0x36   :  { %365 = vmatpush3.bf16.msra.mxu0 %v364_v48  ;;  %v87_v3 = vld [vmem:[#allocation5 + $0x150] sm:$0xff]  ;;  %v88_v5 = vld [vmem:[#allocation5 + $0x158] sm:$0xff]  ;;  %v74_v7 = vld [vmem:[#allocation5 + $0xe8] sm:$0xff]  ;;  %v372_v10 = vpack.c.bf16 %v56_v2, %v55_v1 }
  0x37   :  { %367 = vmatprep.subr.bf16.mxu0 %v366_v52  ;;  %v105_v8 = vld [vmem:[#allocation5 + $0x1e0] sm:$0xff]  ;;  %v106_v9 = vld [vmem:[#allocation5 + $0x1e8] sm:$0xff]  ;;  %v404_v13 = vpack.c.bf16 %v88_v5, %v87_v3  ;;  %v374_v14 = vpack.c.bf16 %v74_v7, %v73_v6  ;;  %v41_v16 = vld [vmem:[#allocation2] sm:$0xff] }
  0x38   :  { %397 = vmatpush3.bf16.msra.mxu1 %v396_v51  ;;  %v57_v11 = vld [vmem:[#allocation5 + $0x60] sm:$0xff]  ;;  %v58_v12 = vld [vmem:[#allocation5 + $0x68] sm:$0xff]  ;;  %v42_v17 = vld [vmem:[#allocation2 + $0x8] sm:$0xff]  ;;  %v406_v18 = vpack.c.bf16 %v106_v9, %v105_v8  ;;  %v43_v22 = vmax.f32 %v41_v16, 0.0 }
  0x39   :  { %399 = vmatprep.subr.bf16.mxu1 %v398_v56  ;;  %v89_v15 = vld [vmem:[#allocation5 + $0x160] sm:$0xff]  ;;  %v90_v19 = vld [vmem:[#allocation5 + $0x168] sm:$0xff]  ;;  %v75_v20 = vld [vmem:[#allocation5 + $0xf0] sm:$0xff]  ;;  %v44_v23 = vmax.f32 %v42_v17, 0.0  ;;  %v376_v26 = vpack.c.bf16 %v58_v12, %v57_v11 }
  0x3a   :  { %369 = vmatpush3.bf16.msra.mxu0 %v368_v62  ;;  %v76_v21 = vld [vmem:[#allocation5 + $0xf8] sm:$0xff]  ;;  %v107_v24 = vld [vmem:[#allocation5 + $0x1f0] sm:$0xff]  ;;  %v118_v27 = vcombine.high %v43_v22, %v43_v22  ;;  %v408_v29 = vpack.c.bf16 %v90_v19, %v89_v15 }
  0x3b   :  { %371 = vmatprep.subr.bf16.mxu0 %v370_v0  ;;  %v108_v25 = vld [vmem:[#allocation5 + $0x1f8] sm:$0xff]  ;;  %v119_v28 = vcombine.high %v44_v23, %v44_v23  ;;  %v378_v30 = vpack.c.bf16 %v76_v21, %v75_v20  ;;  %v59_v31 = vld [vmem:[#allocation5 + $0x70] sm:$0xff] }
  0x3c   :  { %401 = vmatpush3.bf16.msra.mxu1 %v400_v63  ;;  %v60_v32 = vld [vmem:[#allocation5 + $0x78] sm:$0xff]  ;;  %v410_v33 = vpack.c.bf16 %v108_v25, %v107_v24  ;;  %v91_v34 = vld [vmem:[#allocation5 + $0x170] sm:$0xff]  ;;  %186 = vmatprep.mubr.f32.mxu0 %v118_v27 }
  0x3d   :  { %403 = vmatprep.subr.bf16.mxu1 %v402_v4  ;;  %v92_v35 = vld [vmem:[#allocation5 + $0x178] sm:$0xff]  ;;  %256 = vmatprep.mubr.f32.mxu1 %v119_v28  ;;  %v380_v36 = vpack.c.bf16 %v60_v32, %v59_v31  ;;  %v279_v39 = vld [vmem:[%s564_s2] ss:$0 sm:$0xff] }
  0x3e   :  { %373 = vmatpush3.bf16.msra.mxu0 %v372_v10  ;;  %v412_v37 = vpack.c.bf16 %v92_v35, %v91_v34 }
  0x3f   :  { %375 = vmatprep.subr.bf16.mxu0 %v374_v14 }
  0x40   :  { %405 = vmatpush3.bf16.msra.mxu1 %v404_v13 }
  0x41   :  { %407 = vmatprep.subr.bf16.mxu1 %v406_v18 }
  0x42   :  { %377 = vmatpush3.bf16.msra.mxu0 %v376_v26 }
  0x43   :  { %379 = vmatprep.subr.bf16.mxu0 %v378_v30 }
  0x44   :  { %409 = vmatpush3.bf16.msra.mxu1 %v408_v29 }
  0x45   :  { %411 = vmatprep.subr.bf16.mxu1 %v410_v33 }
  0x46   :  { %381 = vmatpush3.bf16.msra.mxu0 %v380_v36 }
  0x48   :  { %413 = vmatpush3.bf16.msra.mxu1 %v412_v37 }
  0x49   :  { %187 = vmatmul.mubr.f32.vlgmr.msra.gmra.mrb[0].mxu0 %v43_v22 }
  0x4b   :  { %257 = vmatmul.mubr.f32.vlgmr.msra.gmra.mrb[0].mxu1 %v44_v23 }
 0x11c   :  { %v312_v38 = vpop.f32.mrb[0].mxu0 }
 0x11d   :  { %v313_v40 = vpop.f32.mrb[1].mxu0 }
 0x11e   :  { %v347_v41 = vpop.f32.mrb[0].mxu1  ;;  %v314_v42 = vadd.f32 %v313_v40, %v312_v38 }
 0x11f   :  { %v348_v43 = vpop.f32.mrb[1].mxu1 }
 0x120   :  { %v349_v44 = vadd.f32 %v348_v43, %v347_v41  ;;  %v189_v45 = vadd.f32 %v314_v42, %v279_v39 }
 0x122   :  { %v259_v46 = vadd.f32 %v349_v44, %v189_v45 }
 0x124   :  { %262 = vst [vmem:[#allocation7] sm:$0xf] %v259_v46 }
 0x125   :  { %474 = shalt.err (!%p471_p6)
}
 0x126   :  { %s475_s15 = scalar_lea.hbm %s565_s3, 64 }
 0x127   :  { %p476_p7 = scmp.ne.s32.totalorder %s565_s3, %s475_s15  ;;  %p479_p8 = scmp.lt.u32.totalorder %s475_s15, %s565_s3 }
 0x129   :  { %p481_p9 = pnand %p479_p8, %p476_p7 }
 0x12b   :  { %484 = shalt.err (!%p481_p9)
}
 0x12c   :  { %272 = dma.vmem_to_hbm [thread:$0]  %s270_s12, 64, %s565_s3, [#allocation4]  }
 0x12d   :  { %489 = dma.done.wait [#allocation4], 64  }
 0x12e   :  { %490 = vsyncadd [#allocation4], 4294967232 }
 0x12f   :  { %276 = vsyncpa [#allocation3], 1 }
 0x130   :  { %277 = vsyncpa [#allocation6], 1 }
 0x131   :  { %278 = vsyncpa [#allocation4], 1 }

</bundles_post_ra>
